<compile_context>
chip_gen: v7x
topology: tpu7x:2x2x1
jax: 0.10.0
libtpu: 0.0.40
codegen_flags: <defaults>
</compile_context>

<pallas_src>
import jax
import jax.numpy as jnp
from jax import lax
from jax.experimental import pallas as pl
from jax.experimental.pallas import tpu as pltpu

INPUT_SIZE = 11
N_PREV_GAMES = 10
HIDDEN = 64
HALF_HIDDEN = HIDDEN // 2                 # 32
FLAT = INPUT_SIZE * N_PREV_GAMES          # 110
TOWER = 2 * HIDDEN                        # 128 (fused tower width)
OUT = 2

ACT_DTYPE = jnp.bfloat16                  # streamed input / MXU operand dtype
TILE_B_MAX = 2048                         # max batch tile for multi-block grids
SINGLE_BLOCK_MAX = 1024                   # below this, one full block (no padding/tiling constraints)


def _fcnn_kernel(h_ref, a_ref,
                 w1h_ref, w1a_ref, b1_ref,    # (110,128) x2 bf16, (1,128) f32
                 w2_ref, b2_ref,              # (128,128) bf16,    (1,128) f32
                 pw1_ref, pb1_ref,            # (128,64) bf16,     (1,64)  f32
                 pw2_ref, pb2_ref,            # (64,32)  bf16,     (1,32)  f32
                 pw3t_ref, pb3t_ref,          # (2,32)   bf16,     (2,1)   f32
                 out_ref):                    # (2, tile_b) f32 — lane-dense
    f32 = jnp.float32

    def dense_relu(x, w_ref, b_ref):
        y = jnp.dot(x.astype(w_ref.dtype), w_ref[...], preferred_element_type=f32)
        return jnp.maximum(y + b_ref[...], 0.0)

    # Fused home/away tower layer 1: relu(h @ W1_home + a @ W1_away + b1)
    t = (jnp.dot(h_ref[...], w1h_ref[...], preferred_element_type=f32)
         + jnp.dot(a_ref[...], w1a_ref[...], preferred_element_type=f32))
    t = jnp.maximum(t + b1_ref[...], 0.0)              # (tb, 128) = [h1 | a1]

    t = dense_relu(t, w2_ref, b2_ref)                  # (tb, 128) = [h2 | a2]
    p = dense_relu(t, pw1_ref, pb1_ref)                # (tb, 64)
    p = dense_relu(p, pw2_ref, pb2_ref)                # (tb, 32)

    # Final layer, transposed lane-dense output: (2, tb) = pw3^T contracted
    # with p's feature axis (classic A @ B^T / trans_b MXU form).
    scores_t = lax.dot_general(
        pw3t_ref[...], p.astype(pw3t_ref.dtype),
        dimension_numbers=(((1,), (1,)), ((), ())),
        preferred_element_type=f32)                    # (2, tb)
    out_ref[...] = (scores_t + pb3t_ref[...]).astype(out_ref.dtype)


def init_params(key):
    """PyTorch-style uniform(-1/sqrt(fan_in), 1/sqrt(fan_in)) init (f32 master)."""
    def linear(key, fan_in, fan_out):
        kw, kb = jax.random.split(key)
        bound = 1.0 / jnp.sqrt(fan_in)
        w = jax.random.uniform(kw, (fan_in, fan_out), jnp.float32, -bound, bound)
        b = jax.random.uniform(kb, (1, fan_out), jnp.float32, -bound, bound)
        return w, b

    keys = jax.random.split(key, 7)
    hw1, hb1 = linear(keys[0], FLAT, HIDDEN)
    hw2, hb2 = linear(keys[1], HIDDEN, HIDDEN)
    aw1, ab1 = linear(keys[2], FLAT, HIDDEN)
    aw2, ab2 = linear(keys[3], HIDDEN, HIDDEN)
    pw1, pb1 = linear(keys[4], HIDDEN * 2, HIDDEN)
    pw2, pb2 = linear(keys[5], HIDDEN, HALF_HIDDEN)
    pw3, pb3 = linear(keys[6], HALF_HIDDEN, OUT)
    return (hw1, hb1, hw2, hb2, aw1, ab1, aw2, ab2,
            pw1, pb1, pw2, pb2, pw3, pb3)


def pack_params(params, weight_dtype=ACT_DTYPE):
    """One-time packing into the kernel's fused layout (biases stay f32)."""
    (hw1, hb1, hw2, hb2, aw1, ab1, aw2, ab2,
     pw1, pb1, pw2, pb2, pw3, pb3) = params

    zf = jnp.zeros((FLAT, HIDDEN), jnp.float32)
    zh = jnp.zeros((HIDDEN, HIDDEN), jnp.float32)

    w1h = jnp.concatenate([hw1, zf], axis=1)           # (110, 128) = [hw1 | 0]
    w1a = jnp.concatenate([zf, aw1], axis=1)           # (110, 128) = [0 | aw1]
    b1 = jnp.concatenate([hb1, ab1], axis=1)           # (1, 128)
    w2 = jnp.block([[hw2, zh], [zh, aw2]])             # (128, 128) block-diag
    b2 = jnp.concatenate([hb2, ab2], axis=1)           # (1, 128)
    pw3t = pw3.T                                       # (2, 32)
    pb3t = pb3.T                                       # (2, 1)

    wd = weight_dtype
    return (w1h.astype(wd), w1a.astype(wd), b1,
            w2.astype(wd), b2,
            pw1.astype(wd), pb1,
            pw2.astype(wd), pb2,
            pw3t.astype(wd), pb3t)


def _choose_tile(B):
    """Batch tiling: one full block for small B; otherwise >=2 balanced
    128-multiple tiles (lane-dense transposed output, v7x megacore split)."""
    if B <= SINGLE_BLOCK_MAX:
        return B, 1
    n_blocks = max(2, pl.cdiv(B, TILE_B_MAX))
    if n_blocks % 2:
        n_blocks += 1                                   # even split for 2-TC balance
    tile_b = pl.cdiv(pl.cdiv(B, n_blocks), 128) * 128
    n_blocks = pl.cdiv(B, tile_b)                       # edge block may be partial
    return tile_b, n_blocks


def nba_predictor_forward(home_seq, away_seq, packed):
    """home_seq / away_seq: (B, n_previous_games, input_size).

    Passing already-bf16 sequences makes the input cast a no-op; f32 inputs are
    cast once here (kernel itself streams bf16 = 440 B/sample total).
    """
    B = home_seq.shape[0]
    h = home_seq.reshape(B, -1).astype(ACT_DTYPE)       # (B, 110)
    a = away_seq.reshape(B, -1).astype(ACT_DTYPE)       # (B, 110)

    tile_b, n_blocks = _choose_tile(B)

    (w1h, w1a, b1, w2, b2, pw1, pb1, pw2, pb2, pw3t, pb3t) = packed

    def const_spec(arr):
        # full-shape block, constant index -> stays resident in VMEM across steps
        return pl.BlockSpec(arr.shape, lambda i: (0, 0))

    weight_bytes = sum(int(w.size) * w.dtype.itemsize for w in packed)
    flops = 2 * B * (2 * FLAT * TOWER + TOWER * TOWER + TOWER * HIDDEN
                     + HIDDEN * HALF_HIDDEN + HALF_HIDDEN * OUT)
    bytes_accessed = (2 * B * FLAT * h.dtype.itemsize   # bf16 input stream
                      + B * OUT * 4                     # (2, B) f32 logits
                      + weight_bytes)

    out_t = pl.pallas_call(
        _fcnn_kernel,
        out_shape=jax.ShapeDtypeStruct((OUT, B), jnp.float32),
        grid=(n_blocks,),
        in_specs=[
            pl.BlockSpec((tile_b, FLAT), lambda i: (i, 0)),
            pl.BlockSpec((tile_b, FLAT), lambda i: (i, 0)),
            const_spec(w1h), const_spec(w1a), const_spec(b1),
            const_spec(w2), const_spec(b2),
            const_spec(pw1), const_spec(pb1),
            const_spec(pw2), const_spec(pb2),
            const_spec(pw3t), const_spec(pb3t),
        ],
        out_specs=pl.BlockSpec((OUT, tile_b), lambda i: (0, i)),
        compiler_params=pltpu.CompilerParams(
            dimension_semantics=("parallel",),
            vmem_limit_bytes=32 * 1024 * 1024),
        cost_estimate=pl.CostEstimate(
            flops=flops, transcendentals=0, bytes_accessed=bytes_accessed),
    )(h, a, w1h, w1a, b1, w2, b2, pw1, pb1, pw2, pb2, pw3t, pb3t)

    return out_t.T                                      # (B, 2)


def reference_forward(home_seq, away_seq, params):
    """Pure-JAX f32 reference (matches the PyTorch module)."""
    (hw1, hb1, hw2, hb2, aw1, ab1, aw2, ab2,
     pw1, pb1, pw2, pb2, pw3, pb3) = params
    B = home_seq.shape[0]
    hf = home_seq.reshape(B, -1)
    af = away_seq.reshape(B, -1)
    h = jax.nn.relu(hf @ hw1 + hb1)
    h = jax.nn.relu(h @ hw2 + hb2)
    a = jax.nn.relu(af @ aw1 + ab1)
    a = jax.nn.relu(a @ aw2 + ab2)
    c = jnp.concatenate([h, a], axis=1)
    p = jax.nn.relu(c @ pw1 + pb1)
    p = jax.nn.relu(p @ pw2 + pb2)
    return p @ pw3 + pb3


# TODO(synk): train_model (Adam optimizer / MSE training loop / early stopping)
# is host-side training logic with no Pallas equivalent; only forward is ported.

if __name__ == "__main__":
    key = jax.random.PRNGKey(0)
    k_params, k_home, k_away = jax.random.split(key, 3)

    params = init_params(k_params)
    packed = pack_params(params)

    B = 4
    home_seq = jax.random.normal(k_home, (B, N_PREV_GAMES, INPUT_SIZE), jnp.float32)
    away_seq = jax.random.normal(k_away, (B, N_PREV_GAMES, INPUT_SIZE), jnp.float32)

    scores = jax.block_until_ready(nba_predictor_forward(home_seq, away_seq, packed))
    ref = jax.block_until_ready(reference_forward(home_seq, away_seq, params))

    assert scores.shape == (B, OUT), scores.shape
    # bf16 input/weight streaming (f32 accumulation) vs. f32 reference.
    assert jnp.allclose(scores, ref, atol=5e-2, rtol=5e-2), (scores, ref)
    print("KERNEL_OK")
</pallas_src>

<mosaic_0001>
module attributes {stable_mosaic.version = 11 : i64} {
  func.func @_fcnn_kernel(%arg0: i32, %arg1: memref<4x110xbf16, #tpu.memory_space<vmem>>, %arg2: memref<4x110xbf16, #tpu.memory_space<vmem>>, %arg3: memref<110x128xbf16, #tpu.memory_space<vmem>>, %arg4: memref<110x128xbf16, #tpu.memory_space<vmem>>, %arg5: memref<1x128xf32, #tpu.memory_space<vmem>>, %arg6: memref<128x128xbf16, #tpu.memory_space<vmem>>, %arg7: memref<1x128xf32, #tpu.memory_space<vmem>>, %arg8: memref<128x64xbf16, #tpu.memory_space<vmem>>, %arg9: memref<1x64xf32, #tpu.memory_space<vmem>>, %arg10: memref<64x32xbf16, #tpu.memory_space<vmem>>, %arg11: memref<1x32xf32, #tpu.memory_space<vmem>>, %arg12: memref<2x32xbf16, #tpu.memory_space<vmem>>, %arg13: memref<2x1xf32, #tpu.memory_space<vmem>>, %arg14: memref<2x4xf32, #tpu.memory_space<vmem>>) attributes {dimension_semantics = [#tpu.dimension_semantics<parallel>], iteration_bounds = array<i64: 1>, scalar_prefetch = 0 : i64, scratch_operands = 0 : i64, tpu.core_type = #tpu.core_type<tc>, window_params = [{transform_indices = @transform_0, window_bounds = array<i64: 4, 110>}, {transform_indices = @transform_1, window_bounds = array<i64: 4, 110>}, {pipeline_mode = #tpu.pipeline_mode<synchronous>, transform_indices = @transform_2, window_bounds = array<i64: 110, 128>}, {pipeline_mode = #tpu.pipeline_mode<synchronous>, transform_indices = @transform_3, window_bounds = array<i64: 110, 128>}, {pipeline_mode = #tpu.pipeline_mode<synchronous>, transform_indices = @transform_4, window_bounds = array<i64: 1, 128>}, {pipeline_mode = #tpu.pipeline_mode<synchronous>, transform_indices = @transform_5, window_bounds = array<i64: 128, 128>}, {pipeline_mode = #tpu.pipeline_mode<synchronous>, transform_indices = @transform_6, window_bounds = array<i64: 1, 128>}, {pipeline_mode = #tpu.pipeline_mode<synchronous>, transform_indices = @transform_7, window_bounds = array<i64: 128, 64>}, {pipeline_mode = #tpu.pipeline_mode<synchronous>, transform_indices = @transform_8, window_bounds = array<i64: 1, 64>}, {pipeline_mode = #tpu.pipeline_mode<synchronous>, transform_indices = @transform_9, window_bounds = array<i64: 64, 32>}, {pipeline_mode = #tpu.pipeline_mode<synchronous>, transform_indices = @transform_10, window_bounds = array<i64: 1, 32>}, {pipeline_mode = #tpu.pipeline_mode<synchronous>, transform_indices = @transform_11, window_bounds = array<i64: 2, 32>}, {pipeline_mode = #tpu.pipeline_mode<synchronous>, transform_indices = @transform_12, window_bounds = array<i64: 2, 1>}, {transform_indices = @transform_13, window_bounds = array<i64: 2, 4>}]} {
    %c0 = arith.constant 0 : index
    %c0_0 = arith.constant 0 : index
    %0 = vector.load %arg1[%c0, %c0_0] : memref<4x110xbf16, #tpu.memory_space<vmem>>, vector<4x110xbf16>
    %c0_1 = arith.constant 0 : index
    %c0_2 = arith.constant 0 : index
    %1 = vector.load %arg3[%c0_1, %c0_2] : memref<110x128xbf16, #tpu.memory_space<vmem>>, vector<110x128xbf16>
    %cst = arith.constant dense<0.000000e+00> : vector<4x128xf32>
    %2 = tpu.matmul %0, %1, %cst {dimension_numbers = #tpu.dot_dimension_numbers<[1], [0], [0], [1], [0, 0, 1, 1], [], []>} : vector<4x110xbf16>, vector<110x128xbf16>, vector<4x128xf32> -> vector<4x128xf32>
    %c0_3 = arith.constant 0 : index
    %c0_4 = arith.constant 0 : index
    %3 = vector.load %arg2[%c0_3, %c0_4] : memref<4x110xbf16, #tpu.memory_space<vmem>>, vector<4x110xbf16>
    %c0_5 = arith.constant 0 : index
    %c0_6 = arith.constant 0 : index
    %4 = vector.load %arg4[%c0_5, %c0_6] : memref<110x128xbf16, #tpu.memory_space<vmem>>, vector<110x128xbf16>
    %cst_7 = arith.constant dense<0.000000e+00> : vector<4x128xf32>
    %5 = tpu.matmul %3, %4, %cst_7 {dimension_numbers = #tpu.dot_dimension_numbers<[1], [0], [0], [1], [0, 0, 1, 1], [], []>} : vector<4x110xbf16>, vector<110x128xbf16>, vector<4x128xf32> -> vector<4x128xf32>
    %6 = arith.addf %2, %5 : vector<4x128xf32>
    %c0_8 = arith.constant 0 : index
    %c0_9 = arith.constant 0 : index
    %7 = vector.load %arg5[%c0_8, %c0_9] : memref<1x128xf32, #tpu.memory_space<vmem>>, vector<1x128xf32>
    %8 = vector.broadcast %7 : vector<1x128xf32> to vector<4x128xf32>
    %9 = arith.addf %6, %8 : vector<4x128xf32>
    %cst_10 = arith.constant 0.000000e+00 : f32
    %10 = vector.broadcast %cst_10 : f32 to vector<4x128xf32>
    %11 = arith.maximumf %9, %10 : vector<4x128xf32>
    %12 = arith.truncf %11 : vector<4x128xf32> to vector<4x128xbf16>
    %c0_11 = arith.constant 0 : index
    %c0_12 = arith.constant 0 : index
    %13 = vector.load %arg6[%c0_11, %c0_12] : memref<128x128xbf16, #tpu.memory_space<vmem>>, vector<128x128xbf16>
    %cst_13 = arith.constant dense<0.000000e+00> : vector<4x128xf32>
    %14 = tpu.matmul %12, %13, %cst_13 {dimension_numbers = #tpu.dot_dimension_numbers<[1], [0], [0], [1], [0, 0, 1, 1], [], []>} : vector<4x128xbf16>, vector<128x128xbf16>, vector<4x128xf32> -> vector<4x128xf32>
    %c0_14 = arith.constant 0 : index
    %c0_15 = arith.constant 0 : index
    %15 = vector.load %arg7[%c0_14, %c0_15] : memref<1x128xf32, #tpu.memory_space<vmem>>, vector<1x128xf32>
    %16 = vector.broadcast %15 : vector<1x128xf32> to vector<4x128xf32>
    %17 = arith.addf %14, %16 : vector<4x128xf32>
    %cst_16 = arith.constant 0.000000e+00 : f32
    %18 = vector.broadcast %cst_16 : f32 to vector<4x128xf32>
    %19 = arith.maximumf %17, %18 : vector<4x128xf32>
    %20 = arith.truncf %19 : vector<4x128xf32> to vector<4x128xbf16>
    %c0_17 = arith.constant 0 : index
    %c0_18 = arith.constant 0 : index
    %21 = vector.load %arg8[%c0_17, %c0_18] : memref<128x64xbf16, #tpu.memory_space<vmem>>, vector<128x64xbf16>
    %cst_19 = arith.constant dense<0.000000e+00> : vector<4x64xf32>
    %22 = tpu.matmul %20, %21, %cst_19 {dimension_numbers = #tpu.dot_dimension_numbers<[1], [0], [0], [1], [0, 0, 1, 1], [], []>} : vector<4x128xbf16>, vector<128x64xbf16>, vector<4x64xf32> -> vector<4x64xf32>
    %c0_20 = arith.constant 0 : index
    %c0_21 = arith.constant 0 : index
    %23 = vector.load %arg9[%c0_20, %c0_21] : memref<1x64xf32, #tpu.memory_space<vmem>>, vector<1x64xf32>
    %24 = vector.broadcast %23 : vector<1x64xf32> to vector<4x64xf32>
    %25 = arith.addf %22, %24 : vector<4x64xf32>
    %cst_22 = arith.constant 0.000000e+00 : f32
    %26 = vector.broadcast %cst_22 : f32 to vector<4x64xf32>
    %27 = arith.maximumf %25, %26 : vector<4x64xf32>
    %28 = arith.truncf %27 : vector<4x64xf32> to vector<4x64xbf16>
    %c0_23 = arith.constant 0 : index
    %c0_24 = arith.constant 0 : index
    %29 = vector.load %arg10[%c0_23, %c0_24] : memref<64x32xbf16, #tpu.memory_space<vmem>>, vector<64x32xbf16>
    %cst_25 = arith.constant dense<0.000000e+00> : vector<4x32xf32>
    %30 = tpu.matmul %28, %29, %cst_25 {dimension_numbers = #tpu.dot_dimension_numbers<[1], [0], [0], [1], [0, 0, 1, 1], [], []>} : vector<4x64xbf16>, vector<64x32xbf16>, vector<4x32xf32> -> vector<4x32xf32>
    %c0_26 = arith.constant 0 : index
    %c0_27 = arith.constant 0 : index
    %31 = vector.load %arg11[%c0_26, %c0_27] : memref<1x32xf32, #tpu.memory_space<vmem>>, vector<1x32xf32>
    %32 = vector.broadcast %31 : vector<1x32xf32> to vector<4x32xf32>
    %33 = arith.addf %30, %32 : vector<4x32xf32>
    %cst_28 = arith.constant 0.000000e+00 : f32
    %34 = vector.broadcast %cst_28 : f32 to vector<4x32xf32>
    %35 = arith.maximumf %33, %34 : vector<4x32xf32>
    %c0_29 = arith.constant 0 : index
    %c0_30 = arith.constant 0 : index
    %36 = vector.load %arg12[%c0_29, %c0_30] : memref<2x32xbf16, #tpu.memory_space<vmem>>, vector<2x32xbf16>
    %37 = arith.truncf %35 : vector<4x32xf32> to vector<4x32xbf16>
    %cst_31 = arith.constant dense<0.000000e+00> : vector<2x4xf32>
    %38 = tpu.matmul %36, %37, %cst_31 {dimension_numbers = #tpu.dot_dimension_numbers<[1], [1], [0], [0], [0, 0, 1, 0], [], []>} : vector<2x32xbf16>, vector<4x32xbf16>, vector<2x4xf32> -> vector<2x4xf32>
    %c0_32 = arith.constant 0 : index
    %c0_33 = arith.constant 0 : index
    %39 = vector.load %arg13[%c0_32, %c0_33] : memref<2x1xf32, #tpu.memory_space<vmem>>, vector<2x1xf32>
    %40 = vector.broadcast %39 : vector<2x1xf32> to vector<2x4xf32>
    %41 = arith.addf %38, %40 : vector<2x4xf32>
    %c0_34 = arith.constant 0 : index
    %c0_35 = arith.constant 0 : index
    %42 = vector.load %arg14[%c0_34, %c0_35] : memref<2x4xf32, #tpu.memory_space<vmem>>, vector<2x4xf32>
    tpu.vector_store %arg14[%c0_34, %c0_35], %41 {strides = array<i32>} : memref<2x4xf32, #tpu.memory_space<vmem>>, vector<2x4xf32>,
    return
  }
  func.func @transform_0(%arg0: i32) -> (i32, i32) {
    %c0_i32 = arith.constant 0 : i32
    %c0_i32_0 = arith.constant 0 : i32
    return %arg0, %c0_i32 : i32, i32
  }
  func.func @transform_1(%arg0: i32) -> (i32, i32) {
    %c0_i32 = arith.constant 0 : i32
    %c0_i32_0 = arith.constant 0 : i32
    return %arg0, %c0_i32 : i32, i32
  }
  func.func @transform_2(%arg0: i32) -> (i32, i32) {
    %c0_i32 = arith.constant 0 : i32
    %c0_i32_0 = arith.constant 0 : i32
    %c0_i32_1 = arith.constant 0 : i32
    return %c0_i32, %c0_i32_0 : i32, i32
  }
  func.func @transform_3(%arg0: i32) -> (i32, i32) {
    %c0_i32 = arith.constant 0 : i32
    %c0_i32_0 = arith.constant 0 : i32
    %c0_i32_1 = arith.constant 0 : i32
    return %c0_i32, %c0_i32_0 : i32, i32
  }
  func.func @transform_4(%arg0: i32) -> (i32, i32) {
    %c0_i32 = arith.constant 0 : i32
    %c0_i32_0 = arith.constant 0 : i32
    %c0_i32_1 = arith.constant 0 : i32
    return %c0_i32, %c0_i32_0 : i32, i32
  }
  func.func @transform_5(%arg0: i32) -> (i32, i32) {
    %c0_i32 = arith.constant 0 : i32
    %c0_i32_0 = arith.constant 0 : i32
    %c0_i32_1 = arith.constant 0 : i32
    return %c0_i32, %c0_i32_0 : i32, i32
  }
  func.func @transform_6(%arg0: i32) -> (i32, i32) {
    %c0_i32 = arith.constant 0 : i32
    %c0_i32_0 = arith.constant 0 : i32
    %c0_i32_1 = arith.constant 0 : i32
    return %c0_i32, %c0_i32_0 : i32, i32
  }
  func.func @transform_7(%arg0: i32) -> (i32, i32) {
    %c0_i32 = arith.constant 0 : i32
    %c0_i32_0 = arith.constant 0 : i32
    %c0_i32_1 = arith.constant 0 : i32
    return %c0_i32, %c0_i32_0 : i32, i32
  }
  func.func @transform_8(%arg0: i32) -> (i32, i32) {
    %c0_i32 = arith.constant 0 : i32
    %c0_i32_0 = arith.constant 0 : i32
    %c0_i32_1 = arith.constant 0 : i32
    return %c0_i32, %c0_i32_0 : i32, i32
  }
  func.func @transform_9(%arg0: i32) -> (i32, i32) {
    %c0_i32 = arith.constant 0 : i32
    %c0_i32_0 = arith.constant 0 : i32
    %c0_i32_1 = arith.constant 0 : i32
    return %c0_i32, %c0_i32_0 : i32, i32
  }
  func.func @transform_10(%arg0: i32) -> (i32, i32) {
    %c0_i32 = arith.constant 0 : i32
    %c0_i32_0 = arith.constant 0 : i32
    %c0_i32_1 = arith.constant 0 : i32
    return %c0_i32, %c0_i32_0 : i32, i32
  }
  func.func @transform_11(%arg0: i32) -> (i32, i32) {
    %c0_i32 = arith.constant 0 : i32
    %c0_i32_0 = arith.constant 0 : i32
    %c0_i32_1 = arith.constant 0 : i32
    return %c0_i32, %c0_i32_0 : i32, i32
  }
  func.func @transform_12(%arg0: i32) -> (i32, i32) {
    %c0_i32 = arith.constant 0 : i32
    %c0_i32_0 = arith.constant 0 : i32
    %c0_i32_1 = arith.constant 0 : i32
    return %c0_i32, %c0_i32_0 : i32, i32
  }
  func.func @transform_13(%arg0: i32) -> (i32, i32) {
    %c0_i32 = arith.constant 0 : i32
    %c0_i32_0 = arith.constant 0 : i32
    return %c0_i32, %arg0 : i32, i32
  }
}

</mosaic_0001>

<bundles_post_ra>
// kernel: tpu_custom_call.1
= control target key start
LH: loop header
LB: loop body
LE: loop exit
PB: predicated region body
PF: predicated region fallthrough
CT: control target
= control target key end

     0   :  { %18 = vsyncpa [#allocation3], 0  ;;  %s1180_s0 = inlined_call_operand.vmem [shape: bf16[4,110], index: 0, kind: input, shape index: {}]   ;;  %s1181_s1 = inlined_call_operand.vmem [shape: bf16[4,110], index: 1, kind: input, shape index: {}]   ;;  %s1182_s2 = inlined_call_operand.vmem [shape: bf16[110,128], index: 2, kind: input, shape index: {}]   ;;  %s1183_s3 = inlined_call_operand.hbm [shape: bf16[110,128], index: 3, kind: input, shape index: {}]   ;;  %s1184_s4 = inlined_call_operand.vmem [shape: f32[1,128], index: 4, kind: input, shape index: {}]   ;;  %s1185_s5 = inlined_call_operand.vmem [shape: bf16[128,128], index: 5, kind: input, shape index: {}]   ;;  %s1186_s6 = inlined_call_operand.vmem [shape: f32[1,128], index: 6, kind: input, shape index: {}]   ;;  %s1187_s7 = inlined_call_operand.vmem [shape: bf16[128,64], index: 7, kind: input, shape index: {}]   ;;  %s1188_s8 = inlined_call_operand.vmem [shape: f32[1,64], index: 8, kind: input, shape index: {}]   ;;  %s1189_s9 = inlined_call_operand.vmem [shape: bf16[64,32], index: 9, kind: input, shape index: {}]   ;;  %s1190_s10 = inlined_call_operand.vmem [shape: f32[1,32], index: 10, kind: input, shape index: {}]   ;;  %s1191_s11 = inlined_call_operand.vmem [shape: bf16[2,32], index: 11, kind: input, shape index: {}]   ;;  %s1192_s12 = inlined_call_operand.vmem [shape: f32[2,1], index: 12, kind: input, shape index: {}]   ;;  %s1193_s13 = inlined_call_operand.hbm [shape: f32[2,4], index: 13, kind: output, shape index: {}]  }
   0x1   :  { %19 = vsyncpa [#allocation4], 0  ;;  %s925_s25 = smov [#allocation2]   ;;  %s877_s29 = scalar_lea.hbm %s1183_s3, 896 }
   0x2   :  { %s31_s26 = sshll.u32 %s925_s25, 4  ;;  %p878_p0 = scmp.ne.s32.totalorder %s1183_s3, %s877_s29  ;;  %s32_s26 = int_to_ptr.vmem [resolvable:$true] %s31_s26 }
   0x3   :  { %p881_p1 = scmp.lt.u32.totalorder %s877_s29, %s1183_s3 }
   0x5   :  { %p883_p2 = pnand %p881_p1, %p878_p0 }
   0x7   :  { %886 = shalt.err (!%p883_p2)
}
   0x8   :  { %s887_s17 = scalar_lea.vmem %s32_s26, 896  ;;  %p892_p4 = scmp.lt.s32.totalorder %s32_s26, %s32_s26 }
   0x9   :  { %p888_p3 = scmp.ne.s32.totalorder %s32_s26, %s887_s17  ;;  %p893_p5 = scmp.lt.s32.totalorder %s887_s17, %s887_s17 }
   0xb   :  { %p894_p6 = por %p893_p5, %p892_p4 }
   0xd   :  { %p895_p7 = pnand %p894_p6, %p888_p3 }
   0xf   :  { %898 = shalt.err (!%p895_p7)
}
  0x10   :  { %s926_s18 = smov 64   ;;  %s927_s19 = smov 4  }
  0x11   :  { %37 = dma.hbm_to_vmem [thread:$0]  %s1183_s3, 896, %s32_s26, [#allocation3], %s926_s18, %s926_s18, %s927_s19  }
  0x12   :  { %921 = dma.done.wait [#allocation3], 896  }
  0x13   :  { %922 = vsyncadd [#allocation3], 4294966400  ;;  %v928_v0 = vmov 0.0   ;;  %vm929_vm0 = vmmov 0   ;;  %v843_v1 = vld [vmem:[#allocation2] sm:$0xff]   ;;  %v845_v3 = vld [vmem:[#allocation2 + $0x8] sm:$0xff]  }
  0x14   :  { %741 = vmatprep.subr.bf16.mxu0 %v928_v0  ;;  %759 = vmatprep.subr.bf16.mxu1 %v928_v0  ;;  %v844_v2 = vld [vmem:[%s1182_s2] sm:$0xff]   ;;  %v846_v4 = vld [vmem:[%s1182_s2 + $0x8] sm:$0xff]   ;;  %v847_v5 = vld [vmem:[#allocation2 + $0x10] sm:$0xff]   ;;  %vm135_vm1 = vcmask 1046528   ;;  %vm131_vm2 = vcmask 900096   ;;  %vm541_vm3 = vcmask 523264  }
  0x15   :  { %755 = vmatprep.mubr.msk.bf16.mxu0 %vm929_vm0, %v928_v0  ;;  %773 = vmatprep.mubr.msk.bf16.mxu1 %vm929_vm0, %v928_v0  ;;  %v848_v6 = vld [vmem:[%s1182_s2 + $0x10] sm:$0xff]   ;;  %v849_v7 = vld [vmem:[#allocation2 + $0x18] sm:$0xff]   ;;  %v851_v9 = vld [vmem:[#allocation2 + $0x20] sm:$0xff]   ;;  %vm594_vm4 = vcmask 261120   ;;  %vm641_vm5 = vcmask 25600  }
  0x16   :  { %742 = vmatpush3.bf16.msra.mxu0 %v843_v1  ;;  %760 = vmatpush3.bf16.msra.mxu1 %v844_v2  ;;  %v850_v8 = vld [vmem:[%s1182_s2 + $0x18] sm:$0xff]   ;;  %v852_v10 = vld [vmem:[%s1182_s2 + $0x20] sm:$0xff]   ;;  %v855_v11 = vld [vmem:[#allocation2 + $0x30] sm:$0x7f]  }
  0x17   :  { %743 = vmatprep.subr.bf16.mxu0 %v928_v0  ;;  %761 = vmatprep.subr.bf16.mxu1 %v928_v0  ;;  %v856_v12 = vld [vmem:[%s1182_s2 + $0x30] sm:$0x7f]   ;;  %v853_v13 = vld [vmem:[#allocation2 + $0x28] sm:$0xff]   ;;  %v137_v15 = vsel %vm135_vm1, %v855_v11, 0  ;;  %v75_v17 = vld [vmem:[%s1181_s1] sm:$0x3] }
  0x18   :  { %v854_v14 = vld [vmem:[%s1182_s2 + $0x28] sm:$0xff]   ;;  %v224_v16 = vsel %vm135_vm1, %v856_v12, 0  ;;  %v857_v18 = vld [vmem:[%s1185_s5] sm:$0xff]   ;;  %v859_v21 = vld [vmem:[%s1185_s5 + $0x10] sm:$0xff]  }
  0x19   :  { %v60_v19 = vld [vmem:[%s1180_s0] sm:$0x3]  ;;  %v858_v20 = vld [vmem:[%s1185_s5 + $0x8] sm:$0xff]   ;;  %v860_v22 = vld [vmem:[%s1185_s5 + $0x18] sm:$0xff]  }
  0x1a   :  { %744 = vmatpush3.bf16.msra.mxu0 %v845_v3  ;;  %762 = vmatpush3.bf16.msra.mxu1 %v846_v4  ;;  %v861_v23 = vld [vmem:[%s1185_s5 + $0x20] sm:$0xff]   ;;  %v862_v24 = vld [vmem:[%s1185_s5 + $0x28] sm:$0xff]   ;;  %v863_v25 = vld [vmem:[%s1185_s5 + $0x30] sm:$0xff]  }
  0x1b   :  { %745 = vmatprep.subr.bf16.mxu0 %v928_v0  ;;  %763 = vmatprep.subr.bf16.mxu1 %v928_v0  ;;  %v864_v26 = vld [vmem:[%s1185_s5 + $0x38] sm:$0xff]   ;;  %v865_v27 = vld [vmem:[%s1187_s7] sm:$0xff]   ;;  %v866_v28 = vld [vmem:[%s1187_s7 + $0x8] sm:$0xff]  }
  0x1c   :  { %v867_v29 = vld [vmem:[%s1187_s7 + $0x10] sm:$0xff]   ;;  %v868_v30 = vld [vmem:[%s1187_s7 + $0x18] sm:$0xff]   ;;  %v869_v31 = vld [vmem:[%s1187_s7 + $0x20] sm:$0xff]  }
  0x1d   :  { %v870_v32 = vld [vmem:[%s1187_s7 + $0x28] sm:$0xff]   ;;  %v674_v35 = vld [vmem:[%s1184_s4] ss:$0 sm:$0xff]  ;;  %v871_v46 = vld [vmem:[%s1187_s7 + $0x30] sm:$0xff]  }
  0x1e   :  { %746 = vmatpush3.bf16.msra.mxu0 %v847_v5  ;;  %764 = vmatpush3.bf16.msra.mxu1 %v848_v6  ;;  %v872_v47 = vld [vmem:[%s1187_s7 + $0x38] sm:$0xff]   ;;  %v873_v48 = vld [vmem:[%s1189_s9] sm:$0xff]   ;;  %v874_v49 = vld [vmem:[%s1189_s9 + $0x8] sm:$0xff]   ;;  %v930_v5 = vmov 0  }
  0x1f   :  { %747 = vmatprep.subr.bf16.mxu0 %v928_v0  ;;  %765 = vmatprep.subr.bf16.mxu1 %v928_v0  ;;  %v675_v50 = vld [vmem:[%s1186_s6] ss:$0 sm:$0xff]  ;;  %v875_v58 = vld [vmem:[%s1189_s9 + $0x10] sm:$0xff]   ;;  %v876_v59 = vld [vmem:[%s1189_s9 + $0x18] sm:$0xff]  }
  0x20   :  { %v684_v60 = vld [vmem:[%s1188_s8] ss:$0 sm:$0xff]  ;;  %842 = vset.pattern.permute.xlu0 %v930_v5 }
  0x21   :  { %v693_v6 = vld [vmem:[%s1190_s10] ss:$0 sm:$0xff] }
  0x22   :  { %748 = vmatpush3.bf16.msra.mxu0 %v849_v7  ;;  %766 = vmatpush3.bf16.msra.mxu1 %v850_v8 }
  0x23   :  { %749 = vmatprep.subr.bf16.mxu0 %v928_v0  ;;  %767 = vmatprep.subr.bf16.mxu1 %v928_v0 }
  0x26   :  { %750 = vmatpush3.bf16.msra.mxu0 %v851_v9  ;;  %768 = vmatpush3.bf16.msra.mxu1 %v852_v10 }
  0x27   :  { %751 = vmatprep.subr.bf16.mxu0 %v928_v0  ;;  %769 = vmatprep.subr.bf16.mxu1 %v928_v0 }
  0x2a   :  { %752 = vmatpush3.bf16.msra.mxu0 %v853_v13  ;;  %770 = vmatpush3.bf16.msra.mxu1 %v854_v14 }
  0x2b   :  { %753 = vmatprep.subr.bf16.mxu0 %v928_v0  ;;  %771 = vmatprep.subr.bf16.mxu1 %v928_v0 }
  0x2e   :  { %754 = vmatpush3.bf16.msra.mxu0 %v137_v15  ;;  %772 = vmatpush3.bf16.msra.mxu1 %v224_v16  ;;  %v586_v15 = vld [vmem:[%s1191_s11] sm:$0x1] }
  0x2f   :  { %777 = vmatprep.subr.bf16.mxu0 %v928_v0  ;;  %797 = vmatprep.subr.bf16.mxu1 %v928_v0 }
  0x31   :  { %756 = vmatmul.mubr.msk.bf16.vlgmr.msra.gmra.mrb[0].mxu0 %vm131_vm2, %v75_v17  ;;  %774 = vmatmul.mubr.msk.bf16.vlgmr.msra.gmra.mrb[0].mxu1 %vm131_vm2, %v60_v19 }
  0x32   :  { %778 = vmatpush3.bf16.msra.mxu0 %v857_v18  ;;  %793 = vmatprep.mubr.msk.bf16.mxu0 %vm929_vm0, %v928_v0 }
  0x33   :  { %779 = vmatprep.subr.bf16.mxu0 %v928_v0  ;;  %813 = vmatprep.mubr.msk.bf16.mxu1 %vm929_vm0, %v928_v0 }
  0x34   :  { %798 = vmatpush3.bf16.msra.mxu1 %v865_v27 }
  0x35   :  { %799 = vmatprep.subr.bf16.mxu1 %v928_v0 }
  0x36   :  { %780 = vmatpush3.bf16.msra.mxu0 %v858_v20 }
  0x37   :  { %781 = vmatprep.subr.bf16.mxu0 %v928_v0 }
  0x38   :  { %800 = vmatpush3.bf16.msra.mxu1 %v866_v28 }
  0x39   :  { %801 = vmatprep.subr.bf16.mxu1 %v928_v0 }
  0x3a   :  { %782 = vmatpush3.bf16.msra.mxu0 %v859_v21 }
  0x3b   :  { %783 = vmatprep.subr.bf16.mxu0 %v928_v0 }
  0x3c   :  { %802 = vmatpush3.bf16.msra.mxu1 %v867_v29 }
  0x3d   :  { %803 = vmatprep.subr.bf16.mxu1 %v928_v0 }
  0x3e   :  { %784 = vmatpush3.bf16.msra.mxu0 %v860_v22 }
  0x3f   :  { %785 = vmatprep.subr.bf16.mxu0 %v928_v0 }
  0x40   :  { %804 = vmatpush3.bf16.msra.mxu1 %v868_v30 }
  0x41   :  { %805 = vmatprep.subr.bf16.mxu1 %v928_v0 }
  0x42   :  { %786 = vmatpush3.bf16.msra.mxu0 %v861_v23 }
  0x43   :  { %787 = vmatprep.subr.bf16.mxu0 %v928_v0 }
  0x44   :  { %806 = vmatpush3.bf16.msra.mxu1 %v869_v31 }
  0x45   :  { %807 = vmatprep.subr.bf16.mxu1 %v928_v0 }
  0x46   :  { %788 = vmatpush3.bf16.msra.mxu0 %v862_v24 }
  0x47   :  { %789 = vmatprep.subr.bf16.mxu0 %v928_v0 }
  0x48   :  { %808 = vmatpush3.bf16.msra.mxu1 %v870_v32 }
  0x49   :  { %809 = vmatprep.subr.bf16.mxu1 %v928_v0 }
  0x4a   :  { %790 = vmatpush3.bf16.msra.mxu0 %v863_v25 }
  0x4b   :  { %791 = vmatprep.subr.bf16.mxu0 %v928_v0 }
  0x4c   :  { %810 = vmatpush3.bf16.msra.mxu1 %v871_v46 }
  0x4d   :  { %811 = vmatprep.subr.bf16.mxu1 %v928_v0 }
  0x4e   :  { %792 = vmatpush3.bf16.msra.mxu0 %v864_v26 }
  0x4f   :  { %817 = vmatprep.subr.bf16.mxu0 %v928_v0 }
  0x50   :  { %812 = vmatpush3.bf16.msra.mxu1 %v872_v47 }
  0x51   :  { %829 = vmatprep.subr.bf16.mxu1 %v928_v0 }
 0x104   :  { %v173_v33 = vpop.f32.mrb[0].mxu0  ;;  %v260_v34 = vpop.f32.mrb[0].mxu1 }
 0x105   :  { %v757_v36 = vpop.f32.mrb[1].mxu0  ;;  %v261_v37 = vadd.f32 %v260_v34, %v173_v33  ;;  %v775_v38 = vpop.f32.mrb[1].mxu1 }
 0x106   :  { %v176_v39 = vpop.f32.mrb[2].mxu0  ;;  %v263_v40 = vpop.f32.mrb[2].mxu1 }
 0x107   :  { %v758_v41 = vpop.f32.mrb[3].mxu0  ;;  %v273_v42 = vadd.f32 %v674_v35, %v261_v37  ;;  %v776_v43 = vpop.f32.mrb[3].mxu1 }
 0x109   :  { %v274_v44 = vmax.f32 %v273_v42, 0.0 }
 0x10b   :  { %v275_v45 = vpack.c.bf16 %v274_v44, %v274_v44 }
 0x10d   :  { %794 = vmatmul.mubr.bf16.vlgmr.msra.gmra.mrb[4].mxu0 %v275_v45 }
 0x10e   :  { %825 = vmatprep.mubr.msk.bf16.mxu0 %vm929_vm0, %v928_v0  ;;  %818 = vmatpush3.bf16.msra.mxu0 %v873_v48 }
 0x10f   :  { %819 = vmatprep.subr.bf16.mxu0 %v928_v0 }
 0x112   :  { %820 = vmatpush3.bf16.msra.mxu0 %v874_v49 }
 0x113   :  { %821 = vmatprep.subr.bf16.mxu0 %v928_v0 }
 0x116   :  { %822 = vmatpush3.bf16.msra.mxu0 %v875_v58 }
 0x117   :  { %823 = vmatprep.subr.bf16.mxu0 %v928_v0 }
 0x11a   :  { %824 = vmatpush3.bf16.msra.mxu0 %v876_v59 }
 0x1e0   :  { %v381_v51 = vpop.f32.mrb[4].mxu0 }
 0x1e1   :  { %v382_v52 = vadd.f32 %v675_v50, %v381_v51  ;;  %v795_v53 = vpop.f32.mrb[5].mxu0 }
 0x1e2   :  { %v384_v54 = vpop.f32.mrb[6].mxu0 }
 0x1e3   :  { %v387_v55 = vmax.f32 %v382_v52, 0.0  ;;  %v796_v56 = vpop.f32.mrb[7].mxu0 }
 0x1e5   :  { %v388_v57 = vpack.c.bf16 %v387_v55, %v387_v55 }
 0x1e7   :  { %814 = vmatmul.mubr.bf16.vlgmr.msra.gmra.mrb[4].mxu1 %v388_v57 }
 0x1e8   :  { %831 = vmatprep.mubr.msk.bf16.mxu1 %vm929_vm0, %v928_v0  ;;  %v588_v0 = vld [vmem:[%s1192_s12] sm:$0x3]  ;;  %s931_s12 = smov [#allocation5]  }
 0x1e9   :  { %591 = vperm.xlu0 %842, %v588_v0   ;;  %s649_s23 = sshll.u32 %s931_s12, 4  ;;  %s650_s23 = int_to_ptr.vmem [resolvable:$true] %s649_s23 }
 0x1ea   :  { %s899_s10 = scalar_lea.vmem %s650_s23, 32  ;;  %p904_p9 = scmp.lt.s32.totalorder %s650_s23, %s650_s23 }
 0x1eb   :  { %p900_p8 = scmp.ne.s32.totalorder %s650_s23, %s899_s10  ;;  %p905_p10 = scmp.lt.s32.totalorder %s899_s10, %s899_s10 }
 0x1ed   :  { %p906_p11 = por %p905_p10, %p904_p9 }
 0x1ef   :  { %p907_p12 = pnand %p906_p11, %p900_p8 }
 0x268   :  { %v592_v16 = vpop.permute.xlu0 %591 }
 0x2ba   :  { %v494_v61 = vpop.f32.mrb[4].mxu1 }
 0x2bb   :  { %v495_v62 = vadd.f32 %v684_v60, %v494_v61  ;;  %v815_v63 = vpop.f32.mrb[5].mxu1 }
 0x2bc   :  { %v497_v1 = vpop.f32.mrb[6].mxu1 }
 0x2bd   :  { %v500_v2 = vmax.f32 %v495_v62, 0.0  ;;  %v816_v3 = vpop.f32.mrb[7].mxu1 }
 0x2bf   :  { %v501_v4 = vpack.c.bf16 %v500_v2, %v500_v2 }
 0x2c1   :  { %826 = vmatmul.mubr.msk.bf16.vlgmr.msra.gmra.mrb[8].mxu0 %vm541_vm3, %v501_v4 }
 0x394   :  { %v579_v7 = vpop.f32.mrb[8].mxu0 }
 0x395   :  { %v580_v8 = vadd.f32 %v693_v6, %v579_v7  ;;  %v827_v9 = vpop.f32.mrb[9].mxu0 }
 0x396   :  { %v582_v10 = vpop.f32.mrb[10].mxu0 }
 0x397   :  { %v585_v11 = vmax.f32 %v580_v8, 0.0  ;;  %v828_v12 = vpop.f32.mrb[11].mxu0 }
 0x399   :  { %v587_v13 = vpack.c.bf16 %v585_v11, %v585_v11 }
 0x39b   :  { %v599_v14 = vsel %vm594_vm4, %v587_v13, 0 }
 0x39c   :  { %830 = vmatpush3.bf16.xpose.msra.mxu1 %v599_v14 }
 0x3a3   :  { %832 = vmatmul.mubr.msk.bf16.vlgmr.msra.gmra.mrb[8].mxu1 %vm594_vm4, %v586_v15 }
 0x476   :  { %v635_v17 = vpop.f32.mrb[8].mxu1 }
 0x477   :  { %v636_v18 = vadd.f32 %v635_v17, %v592_v16  ;;  %v833_v19 = vpop.f32.mrb[9].mxu1 }
 0x478   :  { %v638_v20 = vpop.f32.mrb[10].mxu1 }
 0x479   :  { %v834_v21 = vpop.f32.mrb[11].mxu1  ;;  %642 = vst.msk [vmem:[#allocation5] sm:$0x3] %vm641_vm5, %v636_v18 }
 0x47a   :  { %910 = shalt.err (!%p907_p12)
}
 0x47b   :  { %s911_s3 = scalar_lea.hbm %s1193_s13, 32 }
 0x47c   :  { %p912_p13 = scmp.ne.s32.totalorder %s1193_s13, %s911_s3  ;;  %p915_p0 = scmp.lt.u32.totalorder %s911_s3, %s1193_s13 }
 0x47e   :  { %p917_p1 = pnand %p915_p0, %p912_p13 }
 0x480   :  { %920 = shalt.err (!%p917_p1)
}
 0x481   :  { %652 = dma.vmem_to_hbm [thread:$0]  %s650_s23, 32, %s1193_s13, [#allocation4]  }
 0x482   :  { %923 = dma.done.wait [#allocation4], 32  }
 0x483   :  { %924 = vsyncadd [#allocation4], 4294967264 }
 0x484   :  { %656 = vsyncpa [#allocation3], 1 }
 0x485   :  { %657 = vsyncpa [#allocation4], 1 }

</bundles_post_ra>
